<compile_context>
chip_gen: v6e
topology: v6e:2x2x1
jax: 0.10.0
libtpu: 0.0.40
codegen_flags: <defaults>
</compile_context>

<pallas_src>
import functools

import jax
import jax.numpy as jnp
from jax import lax
from jax.experimental import pallas as pl
from jax.experimental.pallas import tpu as pltpu


def _round_up(x, m):
    return ((x + m - 1) // m) * m


# ----------------------------------------------------------------------------
# Pallas kernel: fused (patches @ W + b) -> LayerNorm(embed_dim)
# ----------------------------------------------------------------------------
def _patch_embed_kernel(x_ref, w_ref, b_ref, g_ref, beta_ref, o_ref, *,
                        eps, e_true, e_pad):
    # x_ref: (TM, Kp) bf16 patch rows       w_ref: (Kp, Ep) bf16 weight
    # b_ref/g_ref/beta_ref: (1, Ep) f32     o_ref: (TM, Ep) f32
    # bf16 operands, f32 accumulation on the MXU.
    y = jnp.dot(x_ref[...], w_ref[...], preferred_element_type=jnp.float32)
    y = y + b_ref[...]

    # LayerNorm over the true embed_dim lanes (biased variance, like
    # nn.LayerNorm). Padded E lanes hold exact zeros after the dot+bias (the
    # weight/bias padding is zero), so the sum for the mean is already correct;
    # they only need to be masked out of the variance.
    inv_e = 1.0 / e_true
    mean = jnp.sum(y, axis=-1, keepdims=True) * inv_e
    centered = y - mean
    if e_pad != e_true:
        lane = lax.broadcasted_iota(jnp.int32, (1, e_pad), 1)
        centered = jnp.where(lane < e_true, centered, 0.0)
    var = jnp.sum(centered * centered, axis=-1, keepdims=True) * inv_e
    y_norm = centered * lax.rsqrt(var + eps)
    # gamma/beta padded lanes are zero -> padded output lanes stay zero.
    o_ref[...] = (y_norm * g_ref[...] + beta_ref[...]).astype(o_ref.dtype)


def _fused_proj_layernorm(patches, w_t, bias, gamma, beta, *, eps=1e-5,
                          tm_max=512):
    """patches: (M, K) f32, w_t: (K, E), bias/gamma/beta: (E,). Returns (M, E) f32."""
    M, K = patches.shape
    E = w_t.shape[1]

    # Lane-dense padding of the contracting and embed dims.
    K_pad = _round_up(K, 128)
    E_pad = _round_up(E, 128)

    # Big M tile (amortize ~0.35us/step grid overhead, fill MXU rows), capped
    # for tiny inputs so we don't over-pad.
    tm = min(tm_max, _round_up(M, 8))
    M_pad = _round_up(M, tm)

    # bf16 matmul operands (halves HBM traffic; MXU is bf16-native).
    patches_b = patches.astype(jnp.bfloat16)
    if M_pad != M or K_pad != K:
        patches_b = jnp.pad(patches_b, ((0, M_pad - M), (0, K_pad - K)))
    w_b = w_t.astype(jnp.bfloat16)
    if K_pad != K or E_pad != E:
        w_b = jnp.pad(w_b, ((0, K_pad - K), (0, E_pad - E)))

    def _pad_vec(v):
        v = v.astype(jnp.float32).reshape(1, E)
        if E_pad != E:
            v = jnp.pad(v, ((0, 0), (0, E_pad - E)))
        return v

    bias2, gamma2, beta2 = _pad_vec(bias), _pad_vec(gamma), _pad_vec(beta)

    out = pl.pallas_call(
        functools.partial(_patch_embed_kernel, eps=eps, e_true=E, e_pad=E_pad),
        out_shape=jax.ShapeDtypeStruct((M_pad, E_pad), jnp.float32),
        grid_spec=pltpu.PrefetchScalarGridSpec(
            num_scalar_prefetch=0,
            grid=(M_pad // tm,),
            in_specs=[
                pl.BlockSpec((tm, K_pad), lambda i: (i, 0)),     # patches tile
                pl.BlockSpec((K_pad, E_pad), lambda i: (0, 0)),  # weight (resident)
                pl.BlockSpec((1, E_pad), lambda i: (0, 0)),      # bias
                pl.BlockSpec((1, E_pad), lambda i: (0, 0)),      # LN gamma
                pl.BlockSpec((1, E_pad), lambda i: (0, 0)),      # LN beta
            ],
            out_specs=pl.BlockSpec((tm, E_pad), lambda i: (i, 0)),
        ),
        compiler_params=pltpu.CompilerParams(
            dimension_semantics=("parallel",),     # shards M tiles across TCs
            vmem_limit_bytes=32 * 1024 * 1024,     # raise v5e's 16 MiB default
        ),
    )(patches_b, w_b, bias2, gamma2, beta2)

    return out[:M, :E]


# ----------------------------------------------------------------------------
# Glue: patch extraction in plain JAX (single reshape/transpose when
# stride == patch_size; strided-slice im2col otherwise).
# ----------------------------------------------------------------------------
# TODO(synk): for the overlapping-stride case the kh*kw-expanded im2col matrix
# still hits HBM; fusing the gather into the kernel (Element-indexed BlockSpecs
# over x) would remove that round trip.
def _extract_patches(x, kh, kw, sh, sw, pad):
    """x: (B, C, H, W) -> (B, N, C*kh*kw), H_new, W_new.

    Feature order along the last axis is (c, i, j), matching
    torch Conv2d weight.reshape(E, C*kh*kw).
    """
    if pad:
        x = jnp.pad(x, ((0, 0), (0, 0), (pad, pad), (pad, pad)))
    B, C, Hp, Wp = x.shape
    H_new = (Hp - kh) // sh + 1
    W_new = (Wp - kw) // sw + 1

    if sh == kh and sw == kw:
        # Non-overlapping patches: no data duplication, just layout plumbing.
        xs = x[:, :, :H_new * kh, :W_new * kw]
        p = xs.reshape(B, C, H_new, kh, W_new, kw)
        p = jnp.transpose(p, (0, 2, 4, 1, 3, 5))        # (B, Hn, Wn, C, kh, kw)
        patches = p.reshape(B, H_new * W_new, C * kh * kw)
        return patches, H_new, W_new

    # General fallback (overlapping windows): strided slices per (i, j) offset.
    slabs = []
    for i in range(kh):
        for j in range(kw):
            s = x[:, :, i:i + (H_new - 1) * sh + 1:sh,
                  j:j + (W_new - 1) * sw + 1:sw]
            slabs.append(s)                              # (B, C, Hn, Wn)
    patches = jnp.stack(slabs, axis=2)                   # (B, C, kh*kw, Hn, Wn)
    patches = patches.reshape(B, C * kh * kw, H_new * W_new)
    patches = jnp.transpose(patches, (0, 2, 1))          # (B, N, C*kh*kw)
    return patches, H_new, W_new


# ----------------------------------------------------------------------------
# PatchEmbed module equivalent
# ----------------------------------------------------------------------------
class PatchEmbedPallas:
    def __init__(self, img_size=224, patch_size=16, in_chans=3, embed_dim=768,
                 stride=None, padding=0, *, key=None):
        if stride is None:
            stride = patch_size
        self.img_size = (img_size, img_size) if isinstance(img_size, int) else tuple(img_size)
        self.kernel_size = (patch_size, patch_size) if isinstance(patch_size, int) else tuple(patch_size)
        self.stride = (stride, stride) if isinstance(stride, int) else tuple(stride)
        self.padding = padding
        self.in_chans = in_chans
        self.embed_dim = embed_dim

        if key is None:
            key = jax.random.PRNGKey(0)
        kw_, kb_, kg_, kbe_ = jax.random.split(key, 4)
        kh, kw = self.kernel_size
        fan_in = in_chans * kh * kw
        bound = 1.0 / (fan_in ** 0.5)
        # Conv2d weight: (E, C, kh, kw); bias: (E,).
        self.proj_w = jax.random.uniform(kw_, (embed_dim, in_chans, kh, kw),
                                         jnp.float32, -bound, bound)
        self.proj_b = jax.random.uniform(kb_, (embed_dim,), jnp.float32, -bound, bound)
        # LayerNorm params (perturbed from 1/0 so the affine path is exercised).
        self.ln_gamma = 1.0 + 0.01 * jax.random.normal(kg_, (embed_dim,), jnp.float32)
        self.ln_beta = 0.01 * jax.random.normal(kbe_, (embed_dim,), jnp.float32)
        self.ln_eps = 1e-5

    def __call__(self, x):
        # x: (B, C, H, W) NCHW, float32
        B, C, H, W = x.shape
        kh, kw = self.kernel_size
        sh, sw = self.stride

        patches, H_new, W_new = _extract_patches(x, kh, kw, sh, sw, self.padding)
        N = H_new * W_new
        K = C * kh * kw

        patches_2d = patches.reshape(B * N, K)
        w_t = self.proj_w.reshape(self.embed_dim, K).T   # (K, E)

        out2d = _fused_proj_layernorm(patches_2d, w_t, self.proj_b,
                                      self.ln_gamma, self.ln_beta,
                                      eps=self.ln_eps)
        out = out2d.reshape(B, N, self.embed_dim)
        return out, (H_new, W_new)


# ----------------------------------------------------------------------------
# Pure-JAX reference for verification
# ----------------------------------------------------------------------------
def _reference(module, x, matmul_dtype=jnp.float32):
    """Module forward; matmul_dtype=bf16 mirrors the kernel's mixed precision."""
    xq = x.astype(matmul_dtype)
    wq = module.proj_w.astype(matmul_dtype)
    y = lax.conv_general_dilated(
        xq, wq,
        window_strides=module.stride,
        padding=[(module.padding, module.padding)] * 2,
        dimension_numbers=("NCHW", "OIHW", "NCHW"),
        preferred_element_type=jnp.float32)
    y = y + module.proj_b[None, :, None, None]
    B, E, H_new, W_new = y.shape
    y = y.reshape(B, E, H_new * W_new).transpose(0, 2, 1)   # (B, N, E)
    mean = jnp.mean(y, axis=-1, keepdims=True)
    var = jnp.mean((y - mean) ** 2, axis=-1, keepdims=True)
    y = (y - mean) * lax.rsqrt(var + module.ln_eps)
    y = y * module.ln_gamma + module.ln_beta
    return y, (H_new, W_new)


if __name__ == "__main__":
    # Small shapes consistent with the module: B=2, C=4, 16x16 image,
    # patch_size=4 (stride defaults to patch_size), embed_dim=32.
    key = jax.random.PRNGKey(0)
    k_x, k_params = jax.random.split(key)

    B, C, H, W = 2, 4, 16, 16
    x = jax.random.normal(k_x, (B, C, H, W), jnp.float32)

    module = PatchEmbedPallas(img_size=(H, W), patch_size=4, in_chans=C,
                              embed_dim=32, key=k_params)

    out, (h_new, w_new) = module(x)
    out = jax.block_until_ready(out)

    # Tight check vs. the same bf16-matmul / f32-accumulate precision policy.
    ref_bf16, (h_r, w_r) = _reference(module, x, matmul_dtype=jnp.bfloat16)
    ref_bf16 = jax.block_until_ready(ref_bf16)
    # Loose sanity check vs. pure-f32 module semantics (bf16 quantization only).
    ref_f32, _ = _reference(module, x, matmul_dtype=jnp.float32)
    ref_f32 = jax.block_until_ready(ref_f32)

    assert out.shape == (B, h_new * w_new, 32), out.shape
    assert (h_new, w_new) == (h_r, w_r) == (4, 4)
    err_tight = float(jnp.max(jnp.abs(out - ref_bf16)))
    assert jnp.allclose(out, ref_bf16, atol=2e-3, rtol=2e-3), err_tight
    err_f32 = float(jnp.max(jnp.abs(out - ref_f32)))
    assert jnp.allclose(out, ref_f32, atol=1e-1, rtol=1e-1), err_f32

    print("KERNEL_OK")
</pallas_src>

<mosaic_0001>
module attributes {stable_mosaic.version = 11 : i64} {
  func.func @_patch_embed_kernel(%arg0: i32, %arg1: memref<32x128xbf16, #tpu.memory_space<vmem>>, %arg2: memref<128x128xbf16, #tpu.memory_space<vmem>>, %arg3: memref<1x128xf32, #tpu.memory_space<vmem>>, %arg4: memref<1x128xf32, #tpu.memory_space<vmem>>, %arg5: memref<1x128xf32, #tpu.memory_space<vmem>>, %arg6: memref<32x128xf32, #tpu.memory_space<vmem>>) attributes {dimension_semantics = [#tpu.dimension_semantics<parallel>], iteration_bounds = array<i64: 1>, scalar_prefetch = 0 : i64, scratch_operands = 0 : i64, tpu.core_type = #tpu.core_type<tc>, window_params = [{transform_indices = @transform_0, window_bounds = array<i64: 32, 128>}, {pipeline_mode = #tpu.pipeline_mode<synchronous>, transform_indices = @transform_1, window_bounds = array<i64: 128, 128>}, {pipeline_mode = #tpu.pipeline_mode<synchronous>, transform_indices = @transform_2, window_bounds = array<i64: 1, 128>}, {pipeline_mode = #tpu.pipeline_mode<synchronous>, transform_indices = @transform_3, window_bounds = array<i64: 1, 128>}, {pipeline_mode = #tpu.pipeline_mode<synchronous>, transform_indices = @transform_4, window_bounds = array<i64: 1, 128>}, {transform_indices = @transform_5, window_bounds = array<i64: 32, 128>}]} {
    %c0 = arith.constant 0 : index
    %c0_0 = arith.constant 0 : index
    %0 = vector.load %arg1[%c0, %c0_0] : memref<32x128xbf16, #tpu.memory_space<vmem>>, vector<32x128xbf16>
    %c0_1 = arith.constant 0 : index
    %c0_2 = arith.constant 0 : index
    %1 = vector.load %arg2[%c0_1, %c0_2] : memref<128x128xbf16, #tpu.memory_space<vmem>>, vector<128x128xbf16>
    %cst = arith.constant dense<0.000000e+00> : vector<32x128xf32>
    %2 = tpu.matmul %0, %1, %cst {dimension_numbers = #tpu.dot_dimension_numbers<[1], [0], [0], [1], [0, 0, 1, 1], [], []>} : vector<32x128xbf16>, vector<128x128xbf16>, vector<32x128xf32> -> vector<32x128xf32>
    %c0_3 = arith.constant 0 : index
    %c0_4 = arith.constant 0 : index
    %3 = vector.load %arg3[%c0_3, %c0_4] : memref<1x128xf32, #tpu.memory_space<vmem>>, vector<1x128xf32>
    %4 = vector.broadcast %3 : vector<1x128xf32> to vector<32x128xf32>
    %5 = arith.addf %2, %4 : vector<32x128xf32>
    %cst_5 = arith.constant dense<0.000000e+00> : vector<32xf32>
    %6 = vector.multi_reduction <add>, %5, %cst_5 [1] : vector<32x128xf32> to vector<32xf32>
    %7 = vector.shape_cast %6 : vector<32xf32> to vector<32x1xf32>
    %cst_6 = arith.constant 3.125000e-02 : f32
    %8 = vector.broadcast %cst_6 : f32 to vector<32x1xf32>
    %9 = arith.mulf %7, %8 : vector<32x1xf32>
    %10 = vector.broadcast %9 : vector<32x1xf32> to vector<32x128xf32>
    %11 = arith.subf %5, %10 : vector<32x128xf32>
    %12 = tpu.iota {dimensions = array<i32: 1>} : vector<1x128xi32>
    %c32_i32 = arith.constant 32 : i32
    %13 = vector.broadcast %c32_i32 : i32 to vector<1x128xi32>
    %14 = arith.cmpi slt, %12, %13 : vector<1x128xi32>
    %cst_7 = arith.constant 0.000000e+00 : f32
    %15 = vector.shape_cast %14 : vector<1x128xi1> to vector<1x128xi1>
    %16 = vector.broadcast %15 : vector<1x128xi1> to vector<32x128xi1>
    %17 = vector.broadcast %cst_7 : f32 to vector<32x128xf32>
    %18 = arith.select %16, %11, %17 : vector<32x128xi1>, vector<32x128xf32>
    %19 = arith.mulf %18, %18 : vector<32x128xf32>
    %cst_8 = arith.constant dense<0.000000e+00> : vector<32xf32>
    %20 = vector.multi_reduction <add>, %19, %cst_8 [1] : vector<32x128xf32> to vector<32xf32>
    %21 = vector.shape_cast %20 : vector<32xf32> to vector<32x1xf32>
    %cst_9 = arith.constant 3.125000e-02 : f32
    %22 = vector.broadcast %cst_9 : f32 to vector<32x1xf32>
    %23 = arith.mulf %21, %22 : vector<32x1xf32>
    %cst_10 = arith.constant 9.99999974E-6 : f32
    %24 = vector.broadcast %cst_10 : f32 to vector<32x1xf32>
    %25 = arith.addf %23, %24 : vector<32x1xf32>
    %26 = math.rsqrt %25 : vector<32x1xf32>
    %27 = vector.broadcast %26 : vector<32x1xf32> to vector<32x128xf32>
    %28 = arith.mulf %18, %27 : vector<32x128xf32>
    %c0_11 = arith.constant 0 : index
    %c0_12 = arith.constant 0 : index
    %29 = vector.load %arg4[%c0_11, %c0_12] : memref<1x128xf32, #tpu.memory_space<vmem>>, vector<1x128xf32>
    %30 = vector.broadcast %29 : vector<1x128xf32> to vector<32x128xf32>
    %31 = arith.mulf %28, %30 : vector<32x128xf32>
    %c0_13 = arith.constant 0 : index
    %c0_14 = arith.constant 0 : index
    %32 = vector.load %arg5[%c0_13, %c0_14] : memref<1x128xf32, #tpu.memory_space<vmem>>, vector<1x128xf32>
    %33 = vector.broadcast %32 : vector<1x128xf32> to vector<32x128xf32>
    %34 = arith.addf %31, %33 : vector<32x128xf32>
    %c0_15 = arith.constant 0 : index
    %c0_16 = arith.constant 0 : index
    %35 = vector.load %arg6[%c0_15, %c0_16] : memref<32x128xf32, #tpu.memory_space<vmem>>, vector<32x128xf32>
    tpu.vector_store %arg6[%c0_15, %c0_16], %34 {strides = array<i32>} : memref<32x128xf32, #tpu.memory_space<vmem>>, vector<32x128xf32>,
    return
  }
  func.func @transform_0(%arg0: i32) -> (i32, i32) {
    %c0_i32 = arith.constant 0 : i32
    %c0_i32_0 = arith.constant 0 : i32
    return %arg0, %c0_i32 : i32, i32
  }
  func.func @transform_1(%arg0: i32) -> (i32, i32) {
    %c0_i32 = arith.constant 0 : i32
    %c0_i32_0 = arith.constant 0 : i32
    %c0_i32_1 = arith.constant 0 : i32
    return %c0_i32, %c0_i32_0 : i32, i32
  }
  func.func @transform_2(%arg0: i32) -> (i32, i32) {
    %c0_i32 = arith.constant 0 : i32
    %c0_i32_0 = arith.constant 0 : i32
    %c0_i32_1 = arith.constant 0 : i32
    return %c0_i32, %c0_i32_0 : i32, i32
  }
  func.func @transform_3(%arg0: i32) -> (i32, i32) {
    %c0_i32 = arith.constant 0 : i32
    %c0_i32_0 = arith.constant 0 : i32
    %c0_i32_1 = arith.constant 0 : i32
    return %c0_i32, %c0_i32_0 : i32, i32
  }
  func.func @transform_4(%arg0: i32) -> (i32, i32) {
    %c0_i32 = arith.constant 0 : i32
    %c0_i32_0 = arith.constant 0 : i32
    %c0_i32_1 = arith.constant 0 : i32
    return %c0_i32, %c0_i32_0 : i32, i32
  }
  func.func @transform_5(%arg0: i32) -> (i32, i32) {
    %c0_i32 = arith.constant 0 : i32
    %c0_i32_0 = arith.constant 0 : i32
    return %arg0, %c0_i32 : i32, i32
  }
}

</mosaic_0001>

<bundles_post_ra>
// kernel: tpu_custom_call.1
= control target key start
LH: loop header
LB: loop body
LE: loop exit
PB: predicated region body
PF: predicated region fallthrough
CT: control target
= control target key end

     0   :  { %10 = vsyncpa [#allocation3], 0  ;;  %s472_s0 = inlined_call_operand.hbm [shape: bf16[32,128], index: 0, kind: input, shape index: {}]   ;;  %s473_s1 = inlined_call_operand.hbm [shape: bf16[128,128], index: 1, kind: input, shape index: {}]   ;;  %s474_s2 = inlined_call_operand.vmem [shape: f32[1,128], index: 2, kind: input, shape index: {}]   ;;  %s475_s3 = inlined_call_operand.vmem [shape: f32[1,128], index: 3, kind: input, shape index: {}]   ;;  %s476_s4 = inlined_call_operand.vmem [shape: f32[1,128], index: 4, kind: input, shape index: {}]   ;;  %s477_s5 = inlined_call_operand.hbm [shape: f32[32,128], index: 5, kind: output, shape index: {}]  }
   0x1   :  { %11 = vsyncpa [#allocation6], 0 }
   0x2   :  { %12 = vsyncpa [#allocation4], 0  ;;  %s417_s18 = smov [#allocation2]  }
   0x3   :  { %s18_s19 = sshll.u32 %s417_s18, 4  ;;  %s19_s19 = int_to_ptr.vmem [resolvable:$true] %s18_s19 }
   0x4   :  { %s359_s20 = scalar_lea.vmem %s19_s19, 256  ;;  %p364_p1 = scmp.lt.s32.totalorder %s19_s19, %s19_s19 }
   0x5   :  { %p360_p0 = scmp.ne.s32.totalorder %s19_s19, %s359_s20  ;;  %p365_p2 = scmp.lt.s32.totalorder %s359_s20, %s359_s20 }
   0x7   :  { %p366_p3 = por %p365_p2, %p364_p1 }
   0x9   :  { %p367_p4 = pnand %p366_p3, %p360_p0 }
   0xb   :  { %370 = shalt.err (!%p367_p4)
}
   0xc   :  { %s418_s21 = smov 64   ;;  %s419_s22 = smov 4  }
   0xd   :  { %24 = dma.hbm_to_vmem [thread:$0]  %s472_s0, 256, %s19_s19, [#allocation3], %s418_s21, %s418_s21, %s419_s22  }
   0xe   :  { %s420_s25 = smov [#allocation5]  }
   0xf   :  { %s30_s26 = sshll.u32 %s420_s25, 4  ;;  %s31_s26 = int_to_ptr.vmem [resolvable:$true] %s30_s26 }
  0x10   :  { %s379_s27 = scalar_lea.vmem %s31_s26, 1024  ;;  %p384_p6 = scmp.lt.s32.totalorder %s31_s26, %s31_s26 }
  0x11   :  { %p380_p5 = scmp.ne.s32.totalorder %s31_s26, %s379_s27  ;;  %p385_p7 = scmp.lt.s32.totalorder %s379_s27, %s379_s27 }
  0x13   :  { %p386_p8 = por %p385_p7, %p384_p6 }
  0x15   :  { %p387_p9 = pnand %p386_p8, %p380_p5 }
  0x17   :  { %390 = shalt.err (!%p387_p9)
}
  0x18   :  { %36 = dma.hbm_to_vmem [thread:$0]  %s473_s1, 1024, %s31_s26, [#allocation6], %s418_s21, %s418_s21, %s419_s22  }
  0x19   :  { %411 = dma.done.wait [#allocation3], 256  }
  0x1a   :  { %412 = vsyncadd [#allocation3], 4294967040 }
  0x1b   :  { %413 = dma.done.wait [#allocation6], 1024  }
  0x1c   :  { %414 = vsyncadd [#allocation6], 4294966272  ;;  %v333_v0 = vld [vmem:[#allocation5 + $0x38] sm:$0xff]   ;;  %v334_v1 = vld [vmem:[#allocation5 + $0x30] sm:$0xff]   ;;  %v202_v19 = vlaneseq  ;;  %s421_s8 = smov [#allocation7]  }
  0x1d   :  { %306 = vmatprep.subr.bf16.mxu0 %v333_v0  ;;  %v335_v2 = vld [vmem:[#allocation5 + $0x28] sm:$0xff]   ;;  %v336_v3 = vld [vmem:[#allocation5 + $0x20] sm:$0xff]   ;;  %v341_v4 = vld [vmem:[#allocation2] sm:$0xff]  }
  0x1e   :  { %307 = vmatpush3.bf16.msra.mxu0 %v333_v0  ;;  %322 = vmatprep.mubr.bf16.mxu0 %v341_v4  ;;  %v337_v5 = vld [vmem:[#allocation5 + $0x18] sm:$0xff]   ;;  %v338_v6 = vld [vmem:[#allocation5 + $0x10] sm:$0xff]   ;;  %v339_v7 = vld [vmem:[#allocation5 + $0x8] sm:$0xff]   ;;  %v203_v23 = vand.u32 127, %v202_v19 }
  0x1f   :  { %308 = vmatprep.subr.bf16.mxu0 %v334_v1  ;;  %v340_v8 = vld [vmem:[#allocation5] sm:$0xff]   ;;  %v342_v9 = vld [vmem:[#allocation2 + $0x8] sm:$0xff]   ;;  %v283_v10 = vld [vmem:[%s474_s2] ss:$0 sm:$0xff] }
  0x20   :  { %vm204_vm0 = vcmp.lt.s32.totalorder %v203_v23, 32  ;;  %v294_v54 = vld [vmem:[%s475_s3] ss:$0 sm:$0xff]  ;;  %s270_s3 = sshll.u32 %s421_s8, 4  ;;  %s271_s3 = int_to_ptr.vmem [resolvable:$true] %s270_s3 }
  0x21   :  { %v295_v56 = vld [vmem:[%s476_s4] ss:$0 sm:$0xff]  ;;  %s391_s4 = scalar_lea.vmem %s271_s3, 512  ;;  %p396_p11 = scmp.lt.s32.totalorder %s271_s3, %s271_s3 }
  0x22   :  { %309 = vmatpush3.bf16.msra.mxu0 %v334_v1  ;;  %p392_p10 = scmp.ne.s32.totalorder %s271_s3, %s391_s4  ;;  %p397_p12 = scmp.lt.s32.totalorder %s391_s4, %s391_s4 }
  0x23   :  { %310 = vmatprep.subr.bf16.mxu0 %v335_v2 }
  0x24   :  { %p398_p13 = por %p397_p12, %p396_p11 }
  0x26   :  { %311 = vmatpush3.bf16.msra.mxu0 %v335_v2  ;;  %p399_p0 = pnand %p398_p13, %p392_p10 }
  0x27   :  { %312 = vmatprep.subr.bf16.mxu0 %v336_v3 }
  0x2a   :  { %313 = vmatpush3.bf16.msra.mxu0 %v336_v3 }
  0x2b   :  { %314 = vmatprep.subr.bf16.mxu0 %v337_v5 }
  0x2e   :  { %315 = vmatpush3.bf16.msra.mxu0 %v337_v5 }
  0x2f   :  { %316 = vmatprep.subr.bf16.mxu0 %v338_v6 }
  0x32   :  { %317 = vmatpush3.bf16.msra.mxu0 %v338_v6 }
  0x33   :  { %318 = vmatprep.subr.bf16.mxu0 %v339_v7 }
  0x36   :  { %319 = vmatpush3.bf16.msra.mxu0 %v339_v7 }
  0x37   :  { %320 = vmatprep.subr.bf16.mxu0 %v340_v8 }
  0x3a   :  { %321 = vmatpush3.bf16.msra.mxu0 %v340_v8 }
  0x3d   :  { %323 = vmatmul.mubr.bf16.vlgmr.msra.gmra.mxu0 %v342_v9 }
  0xfd   :  { %v324_v11 = vpop.f32.mrf.mxu0 }
  0xfe   :  { %v180_v12 = vadd.f32 %v324_v11, %v283_v10 }
  0xff   :  { %v171_v13 = vpop.f32.mrf.mxu0 }
 0x100   :  { %v172_v14 = vadd.f32 %v283_v10, %v171_v13  ;;  %190 = vadd.xlane.f32.xlu1 %v180_v12 }
 0x101   :  { %v325_v15 = vpop.f32.mrf.mxu0 }
 0x102   :  { %v183_v16 = vadd.f32 %v325_v15, %v283_v10  ;;  %186 = vadd.xlane.f32.xlu0 %v172_v14 }
 0x103   :  { %v174_v17 = vpop.f32.mrf.mxu0 }
 0x104   :  { %v175_v18 = vadd.f32 %v283_v10, %v174_v17  ;;  %192 = vadd.xlane.f32.xlu1 %v183_v16 }
 0x106   :  { %188 = vadd.xlane.f32.xlu0 %v175_v18 }
 0x189   :  { %v191_v20 = vpop.xlane.xlu1 %190 }
 0x18a   :  { %v196_v21 = vmul.f32 0.03125, %v191_v20 }
 0x18b   :  { %v187_v22 = vpop.xlane.xlu0 %186 }
 0x18c   :  { %v194_v24 = vmul.f32 0.03125, %v187_v22  ;;  %v200_v26 = vsub.f32 %v180_v12, %v196_v21 }
 0x18d   :  { %v193_v25 = vpop.xlane.xlu1 %192 }
 0x18e   :  { %v198_v27 = vsub.f32 %v172_v14, %v194_v24  ;;  %v197_v28 = vmul.f32 0.03125, %v193_v25  ;;  %v209_v35 = vsel %vm204_vm0, %v200_v26, 0.0 }
 0x18f   :  { %v189_v29 = vpop.xlane.xlu0 %188  ;;  %v213_v37 = vmul.f32 %v209_v35, %v209_v35 }
 0x190   :  { %v195_v30 = vmul.f32 0.03125, %v189_v29  ;;  %v207_v31 = vsel %vm204_vm0, %v198_v27, 0.0  ;;  %v201_v33 = vsub.f32 %v183_v16, %v197_v28 }
 0x191   :  { %v211_v32 = vmul.f32 %v207_v31, %v207_v31 }
 0x192   :  { %v199_v34 = vsub.f32 %v175_v18, %v195_v30  ;;  %v210_v39 = vsel %vm204_vm0, %v201_v33, 0.0 }
 0x193   :  { %215 = vadd.xlane.f32.xlu0 %v211_v32  ;;  %v214_v40 = vmul.f32 %v210_v39, %v210_v39 }
 0x194   :  { %v208_v36 = vsel %vm204_vm0, %v199_v34, 0.0 }
 0x195   :  { %v212_v38 = vmul.f32 %v208_v36, %v208_v36 }
 0x197   :  { %219 = vadd.xlane.f32.xlu0 %v213_v37  ;;  %217 = vadd.xlane.f32.xlu1 %v212_v38 }
 0x19b   :  { %221 = vadd.xlane.f32.xlu1 %v214_v40 }
 0x21c   :  { %v216_v41 = vpop.xlane.xlu0 %215 }
 0x21d   :  { %v223_v42 = vmul.f32 0.03125, %v216_v41 }
 0x21f   :  { %v227_v43 = vadd.f32 1e-05, %v223_v42 }
 0x220   :  { %v218_v44 = vpop.xlane.xlu1 %217  ;;  %v220_v45 = vpop.xlane.xlu0 %219 }
 0x221   :  { %343 = vrsqrt.f32 %v227_v43  ;;  %v224_v46 = vmul.f32 0.03125, %v218_v44  ;;  %v225_v47 = vmul.f32 0.03125, %v220_v45 }
 0x223   :  { %v228_v48 = vadd.f32 1e-05, %v224_v46  ;;  %v229_v49 = vadd.f32 1e-05, %v225_v47 }
 0x224   :  { %v222_v50 = vpop.xlane.xlu1 %221 }
 0x225   :  { %345 = vrsqrt.f32 %v228_v48  ;;  %v226_v51 = vmul.f32 0.03125, %v222_v50 }
 0x226   :  { %347 = vrsqrt.f32 %v229_v49 }
 0x227   :  { %v230_v52 = vadd.f32 1e-05, %v226_v51 }
 0x229   :  { %349 = vrsqrt.f32 %v230_v52 }
 0x22e   :  { %v344_v53 = vpop.eup %343 }
 0x22f   :  { %v235_v55 = vmul.f32 %v344_v53, %v207_v31 }
 0x231   :  { %v246_v57 = vmul.f32 %v294_v54, %v235_v55 }
 0x232   :  { %v346_v58 = vpop.eup %345 }
 0x233   :  { %v348_v59 = vpop.eup %347  ;;  %v236_v60 = vmul.f32 %v346_v58, %v208_v36  ;;  %v257_v61 = vadd.f32 %v295_v56, %v246_v57 }
 0x234   :  { %v237_v62 = vmul.f32 %v348_v59, %v209_v35 }
 0x235   :  { %v247_v63 = vmul.f32 %v294_v54, %v236_v60  ;;  %261 = vst [vmem:[#allocation7] sm:$0xff] %v257_v61 }
 0x236   :  { %v350_v0 = vpop.eup %349  ;;  %v248_v1 = vmul.f32 %v294_v54, %v237_v62 }
 0x237   :  { %v238_v2 = vmul.f32 %v350_v0, %v210_v39  ;;  %v258_v3 = vadd.f32 %v295_v56, %v247_v63 }
 0x238   :  { %v259_v4 = vadd.f32 %v295_v56, %v248_v1 }
 0x239   :  { %v249_v5 = vmul.f32 %v294_v54, %v238_v2  ;;  %262 = vst [vmem:[#allocation7 + $0x8] sm:$0xff] %v258_v3 }
 0x23a   :  { %263 = vst [vmem:[#allocation7 + $0x10] sm:$0xff] %v259_v4 }
 0x23b   :  { %v260_v6 = vadd.f32 %v295_v56, %v249_v5 }
 0x23d   :  { %264 = vst [vmem:[#allocation7 + $0x18] sm:$0xff] %v260_v6 }
 0x23e   :  { %402 = shalt.err (!%p399_p0)
}
 0x23f   :  { %s422_s9 = smov 128   ;;  %s423_s10 = smov 8  }
 0x240   :  { %276 = dma.vmem_to_hbm [thread:$0]  %s271_s3, 512, %s477_s5, [#allocation4], %s422_s9, %s422_s9, %s423_s10  }
 0x241   :  { %415 = dma.done.wait [#allocation4], 512  }
 0x242   :  { %416 = vsyncadd [#allocation4], 4294966784 }
 0x243   :  { %280 = vsyncpa [#allocation3], 1 }
 0x244   :  { %281 = vsyncpa [#allocation6], 1 }
 0x245   :  { %282 = vsyncpa [#allocation4], 1 }

</bundles_post_ra>
